<compile_context>
chip_gen: v7x
topology: tpu7x:2x2x1
jax: 0.10.0
libtpu: 0.0.40
codegen_flags: <defaults>
</compile_context>

<pallas_src>
import functools
import math

import jax
import jax.numpy as jnp
from jax import lax
from jax.experimental import pallas as pl
from jax.experimental.pallas import tpu as pltpu


def _round_up(x, m):
    return ((x + m - 1) // m) * m


def _gemm_bn_lrelu_kernel(p_ref, w_ref, bias_ref, o_ref, *, neg_slope):
    """One (tm, K_pad) x (K_pad, Cout_pad) GEMM + bias + LeakyReLU.

    p_ref:    (1, tm, K_pad)       im2col patches (bf16/f32)
    w_ref:    (K_pad, Cout_pad)    BN-scale-folded weights (bf16/f32), VMEM-resident
    bias_ref: (1, Cout_pad)        folded BN bias + conv bias (f32)
    o_ref:    (1, tm, Cout_pad)    output tile (bf16 by default)
    """
    acc = jnp.dot(p_ref[0], w_ref[...], preferred_element_type=jnp.float32)
    y = acc + bias_ref[...]                      # BN/conv bias, f32
    y = jnp.where(y >= 0.0, y, neg_slope * y)    # LeakyReLU
    o_ref[0, :, :] = y.astype(o_ref.dtype)


def conv_block_forward(x_nchw, w_oihw, conv_bias, bn_gamma, bn_beta,
                       bn_mean, bn_var, *, stride, padding, eps=1e-5,
                       neg_slope=0.01, compute_dtype=jnp.bfloat16,
                       out_dtype=jnp.bfloat16, channels_last_output=False):
    """Conv2d(stride, padding) -> BatchNorm2d (eval, running stats) -> LeakyReLU.

    x_nchw: (N, Cin, H, W) f32; w_oihw: (Cout, Cin, KH, KW) f32 (PyTorch layout).
    Returns (N, Cout, OH, OW) f32 by default, or (N, OH, OW, Cout) out_dtype if
    channels_last_output=True (avoids the per-block slice+transpose round-trip
    when ConvBlocks are chained).
    """
    n, cin, h, w = x_nchw.shape
    cout, _, kh, kw = w_oihw.shape
    s, p = int(stride), int(padding)
    oh = (h + 2 * p - kh) // s + 1
    ow = (w + 2 * p - kw) // s + 1

    kdim = kh * kw * cin
    k_pad = _round_up(kdim, 128)
    cout_pad = _round_up(cout, 128)

    # GEMM-M (= OH*OW) tiling: target a few hundred rows per grid step.
    m = oh * ow
    n_mt = -(-m // 512)
    tm = _round_up(-(-m // n_mt), 16)
    m_pad = tm * n_mt

    # ---- im2col: pure-XLA layout plumbing (strided slices stay in the
    #      wrapper; the kernel only issues contiguous, lane-dense loads) ----
    x_nhwc = jnp.transpose(x_nchw, (0, 2, 3, 1))
    x_sp = jnp.pad(x_nhwc, ((0, 0), (p, p), (p, p), (0, 0)))
    taps = []
    for ih in range(kh):
        for iw in range(kw):
            taps.append(x_sp[:, ih:ih + s * (oh - 1) + 1:s,
                             iw:iw + s * (ow - 1) + 1:s, :])  # (N, OH, OW, Cin)
    patches = jnp.concatenate(taps, axis=-1)                  # (N, OH, OW, KH*KW*Cin)
    patches = patches.reshape(n, m, kdim)
    patches = jnp.pad(patches, ((0, 0), (0, m_pad - m), (0, k_pad - kdim)))
    patches = patches.astype(compute_dtype)

    # ---- fold BatchNorm (eval mode) + conv bias; scale folded into weights
    #      in f32 BEFORE the bf16 cast (avoids double rounding). ----
    # TODO(synk): training-mode BatchNorm (batch statistics + running-stat
    # update) is not implemented; eval-mode running stats are folded here.
    inv_std = 1.0 / jnp.sqrt(bn_var.astype(jnp.float32) + eps)
    scale = bn_gamma.astype(jnp.float32) * inv_std                       # (Cout,)
    bias = bn_beta.astype(jnp.float32) + (conv_bias.astype(jnp.float32)
                                          - bn_mean.astype(jnp.float32)) * scale
    w_kc = jnp.transpose(w_oihw.astype(jnp.float32), (2, 3, 1, 0)).reshape(kdim, cout)
    w_kc = w_kc * scale[None, :]
    w_kc = jnp.pad(w_kc, ((0, k_pad - kdim), (0, cout_pad - cout)))
    w_kc = w_kc.astype(compute_dtype)
    bias_p = jnp.pad(bias, (0, cout_pad - cout)).reshape(1, cout_pad)

    kernel = functools.partial(_gemm_bn_lrelu_kernel, neg_slope=neg_slope)

    in_itm = jnp.dtype(compute_dtype).itemsize
    out_itm = jnp.dtype(out_dtype).itemsize
    cost = pl.CostEstimate(
        flops=2 * n * m_pad * k_pad * cout_pad,
        transcendentals=0,
        bytes_accessed=(patches.size * in_itm + w_kc.size * in_itm
                        + bias_p.size * 4 + n * m_pad * cout_pad * out_itm))

    # Double-buffered per-step VMEM bytes, with headroom; capped at 64 MiB so
    # the same limit is legal on v7x (64 MiB physical) and v5e/v6e (128 MiB).
    blk_bytes = (tm * k_pad * in_itm + k_pad * cout_pad * in_itm
                 + cout_pad * 4 + tm * cout_pad * out_itm)
    vmem_limit = int(min(64 * 1024 * 1024, max(16 * 1024 * 1024, 8 * blk_bytes)))

    out = pl.pallas_call(
        kernel,
        out_shape=jax.ShapeDtypeStruct((n, m_pad, cout_pad), out_dtype),
        grid=(n, n_mt),
        in_specs=[
            pl.BlockSpec((1, tm, k_pad), lambda b, i: (b, i, 0)),
            pl.BlockSpec((k_pad, cout_pad), lambda b, i: (0, 0)),
            pl.BlockSpec((1, cout_pad), lambda b, i: (0, 0)),
        ],
        out_specs=pl.BlockSpec((1, tm, cout_pad), lambda b, i: (b, i, 0)),
        compiler_params=pltpu.CompilerParams(
            dimension_semantics=("parallel", "parallel"),
            vmem_limit_bytes=vmem_limit),
        cost_estimate=cost,
    )(patches, w_kc, bias_p)

    out = out[:, :m, :].reshape(n, oh, ow, cout_pad)[..., :cout]
    if channels_last_output:
        return out                                   # NHWC, out_dtype (chainable)
    return jnp.transpose(out, (0, 3, 1, 2)).astype(jnp.float32)


def _reference_forward(x_nchw, w_oihw, conv_bias, gamma, beta, mean, var,
                       *, stride, padding, eps=1e-5, neg_slope=0.01):
    """Pure-JAX f32 reference matching torch ConvBlock (BN in eval mode)."""
    x = jnp.transpose(x_nchw, (0, 2, 3, 1))
    w_hwio = jnp.transpose(w_oihw, (2, 3, 1, 0))
    y = lax.conv_general_dilated(
        x, w_hwio, window_strides=(stride, stride),
        padding=[(padding, padding), (padding, padding)],
        dimension_numbers=("NHWC", "HWIO", "NHWC"))
    y = y + conv_bias
    y = (y - mean) / jnp.sqrt(var + eps) * gamma + beta
    y = jnp.where(y >= 0.0, y, neg_slope * y)
    return jnp.transpose(y, (0, 3, 1, 2))


def _run_case(key, n, cin, h, w, cout, k, stride, padding):
    kx, kw_, kb, kg, kbe, km, kv = jax.random.split(key, 7)
    x = jax.random.normal(kx, (n, cin, h, w), jnp.float32)
    bound = 1.0 / math.sqrt(cin * k * k)
    wgt = jax.random.uniform(kw_, (cout, cin, k, k), jnp.float32, -bound, bound)
    conv_bias = jax.random.uniform(kb, (cout,), jnp.float32, -bound, bound)
    gamma = jax.random.uniform(kg, (cout,), jnp.float32, 0.5, 1.5)
    beta = 0.1 * jax.random.normal(kbe, (cout,), jnp.float32)
    running_mean = 0.1 * jax.random.normal(km, (cout,), jnp.float32)
    running_var = jax.random.uniform(kv, (cout,), jnp.float32, 0.5, 1.5)

    out = conv_block_forward(x, wgt, conv_bias, gamma, beta, running_mean,
                             running_var, stride=stride, padding=padding)
    out = jax.block_until_ready(out)

    ref = _reference_forward(x, wgt, conv_bias, gamma, beta, running_mean,
                             running_var, stride=stride, padding=padding)
    oh = (h + 2 * padding - k) // stride + 1
    ow = (w + 2 * padding - k) // stride + 1
    assert out.shape == (n, cout, oh, ow), out.shape
    # bf16 matmul inputs + bf16 output with f32 accumulation -> loosened tol.
    err = float(jnp.max(jnp.abs(out - ref)))
    assert jnp.allclose(out, ref, atol=3e-2, rtol=3e-2), err


if __name__ == "__main__":
    key = jax.random.PRNGKey(0)
    k1, k2 = jax.random.split(key)
    # Matches the PyTorch module at small shapes: strided + padded conv.
    _run_case(k1, n=2, cin=4, h=16, w=16, cout=8, k=3, stride=2, padding=1)
    # Second config: stride 1, no padding (exercises the general im2col path).
    _run_case(k2, n=2, cin=4, h=16, w=16, cout=8, k=3, stride=1, padding=0)
    print("KERNEL_OK")
</pallas_src>

<mosaic_0001>
module attributes {stable_mosaic.version = 11 : i64} {
  func.func @_gemm_bn_lrelu_kernel(%arg0: i32, %arg1: i32, %arg2: memref<1x64x128xbf16, #tpu.memory_space<vmem>>, %arg3: memref<128x128xbf16, #tpu.memory_space<vmem>>, %arg4: memref<1x128xf32, #tpu.memory_space<vmem>>, %arg5: memref<1x64x128xbf16, #tpu.memory_space<vmem>>) attributes {dimension_semantics = [#tpu.dimension_semantics<parallel>, #tpu.dimension_semantics<parallel>], iteration_bounds = array<i64: 2, 1>, scalar_prefetch = 0 : i64, scratch_operands = 0 : i64, tpu.core_type = #tpu.core_type<tc>, window_params = [{transform_indices = @transform_0, window_bounds = array<i64: 1, 64, 128>}, {pipeline_mode = #tpu.pipeline_mode<synchronous>, transform_indices = @transform_1, window_bounds = array<i64: 128, 128>}, {pipeline_mode = #tpu.pipeline_mode<synchronous>, transform_indices = @transform_2, window_bounds = array<i64: 1, 128>}, {transform_indices = @transform_3, window_bounds = array<i64: 1, 64, 128>}]} {
    %c0 = arith.constant 0 : index
    %c0_0 = arith.constant 0 : index
    %c0_1 = arith.constant 0 : index
    %0 = vector.load %arg2[%c0, %c0_0, %c0_1] : memref<1x64x128xbf16, #tpu.memory_space<vmem>>, vector<1x64x128xbf16>
    %1 = vector.shape_cast %0 : vector<1x64x128xbf16> to vector<64x128xbf16>
    %c0_2 = arith.constant 0 : index
    %c0_3 = arith.constant 0 : index
    %2 = vector.load %arg3[%c0_2, %c0_3] : memref<128x128xbf16, #tpu.memory_space<vmem>>, vector<128x128xbf16>
    %cst = arith.constant dense<0.000000e+00> : vector<64x128xf32>
    %3 = tpu.matmul %1, %2, %cst {dimension_numbers = #tpu.dot_dimension_numbers<[1], [0], [0], [1], [0, 0, 1, 1], [], []>} : vector<64x128xbf16>, vector<128x128xbf16>, vector<64x128xf32> -> vector<64x128xf32>
    %c0_4 = arith.constant 0 : index
    %c0_5 = arith.constant 0 : index
    %4 = vector.load %arg4[%c0_4, %c0_5] : memref<1x128xf32, #tpu.memory_space<vmem>>, vector<1x128xf32>
    %5 = vector.broadcast %4 : vector<1x128xf32> to vector<64x128xf32>
    %6 = arith.addf %3, %5 : vector<64x128xf32>
    %cst_6 = arith.constant 0.000000e+00 : f32
    %7 = vector.broadcast %cst_6 : f32 to vector<64x128xf32>
    %8 = arith.cmpf oge, %6, %7 : vector<64x128xf32>
    %cst_7 = arith.constant 0.00999999977 : f32
    %9 = vector.broadcast %cst_7 : f32 to vector<64x128xf32>
    %10 = arith.mulf %9, %6 : vector<64x128xf32>
    %11 = arith.select %8, %6, %10 : vector<64x128xi1>, vector<64x128xf32>
    %12 = arith.truncf %11 : vector<64x128xf32> to vector<64x128xbf16>
    %c0_8 = arith.constant 0 : index
    %c0_9 = arith.constant 0 : index
    %c0_10 = arith.constant 0 : index
    %13 = vector.load %arg5[%c0_8, %c0_9, %c0_10] : memref<1x64x128xbf16, #tpu.memory_space<vmem>>, vector<1x64x128xbf16>
    %14 = vector.shape_cast %13 : vector<1x64x128xbf16> to vector<64x128xbf16>
    %15 = vector.shape_cast %12 : vector<64x128xbf16> to vector<1x64x128xbf16>
    tpu.vector_store %arg5[%c0_8, %c0_9, %c0_10], %15 {strides = array<i32>} : memref<1x64x128xbf16, #tpu.memory_space<vmem>>, vector<1x64x128xbf16>,
    return
  }
  func.func @transform_0(%arg0: i32, %arg1: i32) -> (i32, i32, i32) {
    %c0_i32 = arith.constant 0 : i32
    %c0_i32_0 = arith.constant 0 : i32
    return %arg0, %arg1, %c0_i32 : i32, i32, i32
  }
  func.func @transform_1(%arg0: i32, %arg1: i32) -> (i32, i32) {
    %c0_i32 = arith.constant 0 : i32
    %c0_i32_0 = arith.constant 0 : i32
    %c0_i32_1 = arith.constant 0 : i32
    return %c0_i32, %c0_i32_0 : i32, i32
  }
  func.func @transform_2(%arg0: i32, %arg1: i32) -> (i32, i32) {
    %c0_i32 = arith.constant 0 : i32
    %c0_i32_0 = arith.constant 0 : i32
    %c0_i32_1 = arith.constant 0 : i32
    return %c0_i32, %c0_i32_0 : i32, i32
  }
  func.func @transform_3(%arg0: i32, %arg1: i32) -> (i32, i32, i32) {
    %c0_i32 = arith.constant 0 : i32
    %c0_i32_0 = arith.constant 0 : i32
    return %arg0, %arg1, %c0_i32 : i32, i32, i32
  }
}

</mosaic_0001>

<bundles_post_ra>
// kernel: tpu_custom_call.1
= control target key start
LH: loop header
LB: loop body
LE: loop exit
PB: predicated region body
PF: predicated region fallthrough
CT: control target
= control target key end

     0   :  { %8 = vsyncpa [#allocation3], 0  ;;  %s1195_s0 = inlined_call_operand.hbm [shape: bf16[2,64,128], index: 0, kind: input, shape index: {}]   ;;  %s1196_s1 = inlined_call_operand.hbm [shape: bf16[128,128], index: 1, kind: input, shape index: {}]   ;;  %s1197_s2 = inlined_call_operand.vmem [shape: f32[1,128], index: 2, kind: input, shape index: {}]   ;;  %s1198_s3 = inlined_call_operand.hbm [shape: bf16[2,64,128], index: 3, kind: output, shape index: {}]  }
   0x1   :  { %10 = vsyncpa [#allocation3 + $0x1], 0 }
   0x2   :  { %11 = vsyncpa [#allocation6], 0 }
   0x3   :  { %12 = vsyncpa [#allocation4], 0 }
   0x4   :  { %14 = vsyncpa [#allocation4 + $0x1], 0  ;;  %s955_s12 = smov 0   ;;  %s957_s13 = smov 0  }
   0x5   :  { %s959_s14 = smov 0   ;;  %s961_s15 = smov 0  }
   0x6   :  { %s963_s16 = smov 0   ;;  %s965_s17 = smov 0  }
   0x7 LB: > { %s570_s18 = sadd.s32 4294967295, %s926_s17   ;;  %s571_s19 = sadd.s32 4294967294, %s926_s17   ;;  %s926_s17 = sphi %s965_s17, %s20_s17   ;;  %s922_s16 = sphi %s963_s16, %s1222_s16   ;;  %s918_s15 = sphi %s961_s15, %s1221_s15   ;;  %s914_s14 = sphi %s959_s14, %s1220_s14   ;;  %s910_s13 = sphi %s957_s13, %s1219_s13   ;;  %s906_s12 = sphi %s955_s12, %s1218_s12  }
   0x8   : > { %p54_p0 = scmp.ne.s32.totalorder %s910_s13, %s906_s12  ;;  %p989_p1 = scmp.eq.s32.totalorder %s570_s18, 0 }
   0x9   : > { %p993_p2 = scmp.eq.s32.totalorder %s570_s18, 1  ;;  %p128_p3 = scmp.eq.s32.totalorder %s571_s19, 1 }
   0xa   : > { %s1203_s20 = scalar_select %p989_p1, 1, 0 }
   0xb   : > { %s1204_s21 = scalar_select %p993_p2, 1, 0 }
   0xc   : > { %p999_p4 = por %p989_p1, %p54_p0  ;;  %p572_p5 = scmp.ge.s32.totalorder %s926_s17, 1 }
   0xd   : > { %p1004_p6 = por %p128_p3, %p54_p0  ;;  %p135_p7 = scmp.lt.s32.totalorder %s926_s17, 3 }
   0xe   : > { %s1205_s22 = scalar_select %p999_p4, 1, 0 }
   0xf   : > { %s1206_s23 = scalar_select %p1004_p6, 1, 0 }
  0x10   : > { %p1009_p8 = pnand %p572_p5, %p135_p7  ;;  %s928_s25 = smov [#allocation5]  }
  0x11   : > { %s147_s26 = sshll.u32 %s928_s25, 4  ;;  %s32_s28 = sadd.s32 1, %s922_s16  ;;  %s148_s26 = int_to_ptr.vmem [resolvable:$true] %s147_s26 }
  0x12   : > { %s1207_s24 = scalar_select %p1009_p8, 1, 0 }
  0x13   : > { %p701_p9 = pneg %p1009_p8  ;;  %s782_s4 = scalar_lea.hbm %s1196_s1, 1024 }
  0x14   : > { %p783_p12 = scmp.ne.s32.totalorder %s1196_s1, %s782_s4  ;;  %p789_p5 = scmp.lt.u32.totalorder %s782_s4, %s1196_s1 }
  0x15   : > { %p1018_p11 = pnand %p701_p9, %p989_p1 }
  0x17   : > { %p784_p13 = pneg %p1018_p11 }
  0x19   : > { %p785_p0 = pnand %p784_p13, %p783_p12 }
  0x1b   : > { %p786_p3 = pneg %p785_p0 }
  0x1d   : > { %p791_p7 = pnand %p789_p5, %p786_p3 }
  0x1f   : > { %794 = shalt.err (!%p791_p7)
}
  0x20   : > { %s795_s9 = scalar_lea.vmem %s148_s26, 1024  ;;  %p803_p1 = scmp.lt.s32.totalorder %s148_s26, %s148_s26 }
  0x21   : > { %p796_p9 = scmp.ne.s32.totalorder %s148_s26, %s795_s9  ;;  %p804_p4 = scmp.lt.s32.totalorder %s795_s9, %s795_s9 }
  0x23   : > { %p798_p10 = pnand %p796_p9, %p784_p13  ;;  %p805_p8 = por %p804_p4, %p803_p1 }
  0x25   : > { %p799_p6 = pneg %p798_p10 }
  0x27   : > { %p806_p2 = pnand %p805_p8, %p799_p6 }
  0x29   : > { %809 = shalt.err (!%p806_p2)
}
  0x2a   : > { %s929_s10 = smov 64   ;;  %s930_s11 = smov 4  }
  0x2b   : > { %704 = dma.hbm_to_vmem [thread:$0]  (!%p1018_p11), %s1196_s1, 1024, %s148_s26, [#allocation6], %s929_s10, %s929_s10, %s930_s11  }
  0x2c   : > { %p34_p1 = scmp.ge.s32.totalorder %s32_s28, 2  ;;  %s41_s25 = sadd.s32 1, %s914_s14 }
  0x2d   : > { %p48_p2 = scmp.ne.s32.totalorder %s914_s14, %s910_s13  ;;  %p49_p4 = scmp.eq.s32.totalorder %s926_s17, 0 }
  0x2e   : > { %s1224_s28 = smov (%p34_p1, %s32_s28), 0  ;;  %p1210_p8 = scmp.ne.s32.totalorder %s1204_s21, 0 }
  0x2f   : > { %p1048_p6 = por %p49_p4, %p48_p2  ;;  %s36_s30 = ssub.s32 %s922_s16, %s1224_s28 }
  0x30   : > { %p1054_p10 = por %p1210_p8, %p48_p2  ;;  %p714_p12 = scmp.lt.s32.totalorder %s926_s17, 2 }
  0x31   : > { %p39_p11 = scmp.eq.s32.totalorder %s36_s30, 0  ;;  %s164_s26 = sand.u32 1, %s914_s14  }
  0x32   : > { %s575_s4 = sshll.u32 %s164_s26, 5  ;;  %s608_s6 = sshll.u32 %s922_s16, 9 }
  0x33   : > { %s1063_s5 = scalar_select %p39_p11, %s914_s14, %s41_s25  }
  0x34   : > { %s1069_s9 = scalar_lea.hbm %s1195_s0, %s608_s6  ;;  %s168_s21 = scalar_lea.vmem [#allocation2], %s575_s4 }
  0x35   : > { %s177_s18 = sshll.u32 %s168_s21, 4  ;;  %p1075_p13 = pnand %p714_p12, %p1048_p6  ;;  %s1071_s18 = int_to_ptr.vmem [resolvable:$true] %s177_s18 }
  0x36   : > { %s1079_s25 = scalar_lea.sflag [#allocation3], %s164_s26  ;;  %s810_s30 = scalar_lea.hbm %s1069_s9, 512 }
  0x37   : > { %p811_p0 = scmp.ne.s32.totalorder %s1069_s9, %s810_s30  ;;  %p812_p3 = pneg %p1075_p13 }
  0x38   : > { %s815_s29 = scalar_lea.hbm %s1195_s0, 1024  ;;  %p816_p9 = scmp.lt.u32.totalorder %s1069_s9, %s1195_s0 }
  0x39   : > { %p813_p5 = pnand %p812_p3, %p811_p0  ;;  %p817_p1 = scmp.lt.u32.totalorder %s815_s29, %s810_s30 }
  0x3a   : > { %p819_p4 = scmp.lt.u32.totalorder %s810_s30, %s1069_s9 }
  0x3b   : > { %p814_p7 = pneg %p813_p5  ;;  %p818_p2 = por %p817_p1, %p816_p9 }
  0x3d   : > { %p820_p6 = por %p819_p4, %p818_p2 }
  0x3f   : > { %p821_p8 = pnand %p820_p6, %p814_p7 }
  0x41   : > { %824 = shalt.err (!%p821_p8)
}
  0x42   : > { %s825_s26 = scalar_lea.vmem %s1071_s18, 512  ;;  %s931_s21 = smov [#allocation2]  }
  0x43   : > { %p826_p12 = scmp.ne.s32.totalorder %s1071_s18, %s825_s26  ;;  %s830_s4 = sshll.u32 %s931_s21, 4  ;;  %s831_s4 = int_to_ptr.vmem [resolvable:$false] %s830_s4 }
  0x44   : > { %s832_s6 = scalar_lea.vmem %s831_s4, 1024  ;;  %p833_p5 = scmp.lt.s32.totalorder %s1071_s18, %s831_s4 }
  0x45   : > { %p828_p11 = pnand %p826_p12, %p812_p3  ;;  %p834_p9 = scmp.lt.s32.totalorder %s832_s6, %s825_s26 }
  0x47   : > { %p829_p0 = pneg %p828_p11  ;;  %p835_p1 = por %p834_p9, %p833_p5 }
  0x49   : > { %p836_p2 = pnand %p835_p1, %p829_p0 }
  0x4b   : > { %839 = shalt.err (!%p836_p2)
}
  0x4c   : > { %708 = dma.hbm_to_vmem [thread:$0]  (!%p1075_p13), %s1069_s9, 512, %s1071_s18, %s1079_s25, %s929_s10, %s929_s10, %s930_s11  }
  0x4d   : > { %p1213_p3 = scmp.ne.s32.totalorder %s1207_s24, 0 }
  0x4e   : > { %s1113_s30 = sand.u32 (!%p1213_p3), 1, %s910_s13   ;;  %p1214_p7 = scmp.ne.s32.totalorder (!%p1213_p3), %s1205_s22, 0 }
  0x4f   : > { %189 = sbr.rel (%p1213_p3) target bundleno = 362 (0x16a), region = 32  ;;  %s579_s29 = sshll.u32 (!%p1213_p3), %s1113_s30, 5 }
  0x50   : > { %s192_s7 = scalar_lea.sflag (!%p1213_p3), [#allocation3], %s1113_s30  ;;  %s1119_s19 = scalar_lea.vmem (!%p1213_p3), [#allocation2], %s579_s29 }
  0x56   : > { %893 = dma.done.wait (%p1214_p7), %s192_s7, 512  }
  0x57   : > { %895 = vsyncadd (%p1214_p7), %s192_s7, 4294966784  ;;  %p1215_p13 = scmp.ne.s32.totalorder %s1203_s20, 0 }
  0x59   : > { %897 = dma.done.wait (%p1215_p13), [#allocation6], 1024  }
  0x5a   : > { %899 = vsyncadd (%p1215_p13), [#allocation6], 4294966272  ;;  %v770_v0 = vld [vmem:[#allocation5] sm:$0xff]   ;;  %v771_v1 = vld [vmem:[#allocation5 + $0x8] sm:$0xff]   ;;  %s221_s24 = scalar_lea.vmem [#allocation7], %s579_s29  ;;  %s617_s11 = sshll.u32 %s918_s15, 9 }
  0x5b   : > { %653 = vmatprep.subr.bf16.mxu0 %v770_v0  ;;  %677 = vmatprep.subr.bf16.mxu1 %v770_v0  ;;  %v772_v2 = vld [vmem:[#allocation5 + $0x10] sm:$0xff]   ;;  %v773_v3 = vld [vmem:[#allocation5 + $0x18] sm:$0xff]   ;;  %v778_v4 = vld [vmem:[%s1119_s19] sm:$0xff]   ;;  %s473_s10 = sshll.u32 %s221_s24, 4  ;;  %s1146_s18 = scalar_lea.hbm %s1198_s3, %s617_s11  ;;  %s1141_s10 = int_to_ptr.vmem [resolvable:$true] %s473_s10 }
  0x5c   : > { %654 = vmatpush3.bf16.msra.mxu0 %v770_v0  ;;  %685 = vmatpush3.bf16.msra.mxu1 %v770_v0  ;;  %v779_v5 = vld [vmem:[%s1119_s19 + $0x10] sm:$0xff]   ;;  %v774_v6 = vld [vmem:[#allocation5 + $0x20] sm:$0xff]   ;;  %v775_v7 = vld [vmem:[#allocation5 + $0x28] sm:$0xff]   ;;  %s458_s25 = scalar_lea.sflag [#allocation4], %s1113_s30  ;;  %s840_s8 = scalar_lea.vmem %s1141_s10, 512 }
  0x5d   : > { %655 = vmatprep.subr.bf16.mxu0 %v771_v1  ;;  %678 = vmatprep.subr.bf16.mxu1 %v771_v1  ;;  %v776_v8 = vld [vmem:[#allocation5 + $0x30] sm:$0xff]   ;;  %v777_v9 = vld [vmem:[#allocation5 + $0x38] sm:$0xff]   ;;  %v780_v10 = vld [vmem:[%s1119_s19 + $0x8] sm:$0xff]   ;;  %p841_p4 = scmp.ne.s32.totalorder %s1141_s10, %s840_s8  ;;  %s932_s26 = smov [#allocation7]  }
  0x5e   : > { %669 = vmatprep.mubr.bf16.mxu0 %v778_v4  ;;  %673 = vmatprep.mubr.bf16.mxu1 %v779_v5  ;;  %v781_v11 = vld [vmem:[%s1119_s19 + $0x18] sm:$0xff]   ;;  %v582_v12 = vld [vmem:[%s1197_s2] ss:$0 sm:$0xff]  ;;  %s844_s21 = sshll.u32 %s932_s26, 4  ;;  %s845_s21 = int_to_ptr.vmem [resolvable:$false] %s844_s21 }
  0x5f   : > { %p842_p6 = pnand %p841_p4, %p1054_p10  ;;  %s846_s4 = scalar_lea.vmem %s845_s21, 1024 }
  0x60   : > { %656 = vmatpush3.bf16.msra.mxu0 %v771_v1  ;;  %686 = vmatpush3.bf16.msra.mxu1 %v771_v1  ;;  %p847_p12 = scmp.lt.s32.totalorder %s1141_s10, %s845_s21  ;;  %p848_p11 = scmp.lt.s32.totalorder %s846_s4, %s840_s8 }
  0x61   : > { %657 = vmatprep.subr.bf16.mxu0 %v772_v2  ;;  %679 = vmatprep.subr.bf16.mxu1 %v772_v2  ;;  %p843_p8 = pneg %p842_p6 }
  0x62   : > { %p849_p0 = por %p848_p11, %p847_p12 }
  0x64   : > { %658 = vmatpush3.bf16.msra.mxu0 %v772_v2  ;;  %687 = vmatpush3.bf16.msra.mxu1 %v772_v2  ;;  %p850_p5 = pnand %p849_p0, %p843_p8 }
  0x65   : > { %659 = vmatprep.subr.bf16.mxu0 %v773_v3  ;;  %680 = vmatprep.subr.bf16.mxu1 %v773_v3 }
  0x68   : > { %660 = vmatpush3.bf16.msra.mxu0 %v773_v3  ;;  %688 = vmatpush3.bf16.msra.mxu1 %v773_v3 }
  0x69   : > { %661 = vmatprep.subr.bf16.mxu0 %v774_v6  ;;  %681 = vmatprep.subr.bf16.mxu1 %v774_v6 }
  0x6c   : > { %662 = vmatpush3.bf16.msra.mxu0 %v774_v6  ;;  %689 = vmatpush3.bf16.msra.mxu1 %v774_v6 }
  0x6d   : > { %663 = vmatprep.subr.bf16.mxu0 %v775_v7  ;;  %682 = vmatprep.subr.bf16.mxu1 %v775_v7 }
  0x70   : > { %664 = vmatpush3.bf16.msra.mxu0 %v775_v7  ;;  %690 = vmatpush3.bf16.msra.mxu1 %v775_v7 }
  0x71   : > { %665 = vmatprep.subr.bf16.mxu0 %v776_v8  ;;  %683 = vmatprep.subr.bf16.mxu1 %v776_v8 }
  0x74   : > { %666 = vmatpush3.bf16.msra.mxu0 %v776_v8  ;;  %691 = vmatpush3.bf16.msra.mxu1 %v776_v8 }
  0x75   : > { %667 = vmatprep.subr.bf16.mxu0 %v777_v9  ;;  %684 = vmatprep.subr.bf16.mxu1 %v777_v9 }
  0x78   : > { %668 = vmatpush3.bf16.msra.mxu0 %v777_v9  ;;  %692 = vmatpush3.bf16.msra.mxu1 %v777_v9 }
  0x7b   : > { %670 = vmatmul.mubr.bf16.vlgmr.msra.gmra.mrb[0].mxu0 %v780_v10  ;;  %674 = vmatmul.mubr.bf16.vlgmr.msra.gmra.mrb[0].mxu1 %v781_v11 }
 0x14e   : > { %v671_v13 = vpop.f32.mrb[0].mxu0  ;;  %v675_v14 = vpop.f32.mrb[0].mxu1 }
 0x14f   : > { %v371_v15 = vadd.f32 %v671_v13, %v582_v12  ;;  %v387_v16 = vadd.f32 %v675_v14, %v582_v12  ;;  %v362_v17 = vpop.f32.mrb[1].mxu0  ;;  %v378_v18 = vpop.f32.mrb[1].mxu1 }
 0x150   : > { %v363_v19 = vadd.f32 %v582_v12, %v362_v17  ;;  %v379_v20 = vadd.f32 %v582_v12, %v378_v18  ;;  %v672_v21 = vpop.f32.mrb[2].mxu0  ;;  %v676_v22 = vpop.f32.mrb[2].mxu1 }
 0x151   : > { %vm395_vm0 = vcmp.ge.f32.partialorder %v371_v15, 0.0  ;;  %v403_v23 = vmul.f32 0.01, %v371_v15  ;;  %vm399_vm1 = vcmp.ge.f32.partialorder %v387_v16, 0.0  ;;  %v407_v24 = vmul.f32 0.01, %v387_v16 }
 0x152   : > { %vm393_vm2 = vcmp.ge.f32.partialorder %v363_v19, 0.0  ;;  %v401_v25 = vmul.f32 0.01, %v363_v19  ;;  %vm397_vm3 = vcmp.ge.f32.partialorder %v379_v20, 0.0  ;;  %v405_v26 = vmul.f32 0.01, %v379_v20 }
 0x153   : > { %v374_v27 = vadd.f32 %v672_v21, %v582_v12  ;;  %v390_v28 = vadd.f32 %v676_v22, %v582_v12  ;;  %v365_v29 = vpop.f32.mrb[3].mxu0  ;;  %v381_v30 = vpop.f32.mrb[3].mxu1  ;;  %v411_v31 = vsel %vm395_vm0, %v371_v15, %v403_v23  ;;  %v415_v32 = vsel %vm399_vm1, %v387_v16, %v407_v24 }
 0x154   : > { %v366_v33 = vadd.f32 %v582_v12, %v365_v29  ;;  %v382_v34 = vadd.f32 %v582_v12, %v381_v30  ;;  %v409_v39 = vsel %vm393_vm2, %v363_v19, %v401_v25  ;;  %v413_v40 = vsel %vm397_vm3, %v379_v20, %v405_v26 }
 0x155   : > { %vm396_vm4 = vcmp.ge.f32.partialorder %v374_v27, 0.0  ;;  %v404_v35 = vmul.f32 0.01, %v374_v27  ;;  %vm400_vm5 = vcmp.ge.f32.partialorder %v390_v28, 0.0  ;;  %v408_v36 = vmul.f32 0.01, %v390_v28 }
 0x156   : > { %vm394_vm6 = vcmp.ge.f32.partialorder %v366_v33, 0.0  ;;  %v402_v37 = vmul.f32 0.01, %v366_v33  ;;  %vm398_vm7 = vcmp.ge.f32.partialorder %v382_v34, 0.0  ;;  %v406_v38 = vmul.f32 0.01, %v382_v34 }
 0x157   : > { %v412_v41 = vsel %vm396_vm4, %v374_v27, %v404_v35  ;;  %v416_v42 = vsel %vm400_vm5, %v390_v28, %v408_v36 }
 0x158   : > { %v626_v43 = vpack.c.bf16 %v412_v41, %v411_v31  ;;  %v636_v44 = vpack.c.bf16 %v416_v42, %v415_v32  ;;  %v410_v45 = vsel %vm394_vm6, %v366_v33, %v402_v37  ;;  %v414_v46 = vsel %vm398_vm7, %v382_v34, %v406_v38 }
 0x159   : > { %v621_v47 = vpack.c.bf16 %v410_v45, %v409_v39  ;;  %v631_v48 = vpack.c.bf16 %v414_v46, %v413_v40 }
 0x15a   : > { %638 = vst [vmem:[%s221_s24 + $0x8] sm:$0xff] %v626_v43   ;;  %640 = vst [vmem:[%s221_s24 + $0x18] sm:$0xff] %v636_v44  }
 0x15b   : > { %622 = vst [vmem:[%s221_s24] sm:$0xff] %v621_v47   ;;  %639 = vst [vmem:[%s221_s24 + $0x10] sm:$0xff] %v631_v48  }
 0x15c   : > { %853 = shalt.err (!%p850_p5)
}
 0x15d   : > { %s854_s6 = scalar_lea.hbm %s1146_s18, 512  ;;  %s858_s19 = scalar_lea.hbm %s1198_s3, 1024 }
 0x15e   : > { %p855_p9 = scmp.ne.s32.totalorder %s1146_s18, %s854_s6  ;;  %p859_p3 = scmp.lt.u32.totalorder %s1146_s18, %s1198_s3 }
 0x15f   : > { %p860_p7 = scmp.lt.u32.totalorder %s858_s19, %s854_s6  ;;  %p862_p4 = scmp.lt.u32.totalorder %s854_s6, %s1146_s18 }
 0x160   : > { %p856_p1 = pnand %p855_p9, %p1054_p10 }
 0x161   : > { %p861_p13 = por %p860_p7, %p859_p3 }
 0x162   : > { %p857_p2 = pneg %p856_p1 }
 0x163   : > { %p863_p6 = por %p862_p4, %p861_p13 }
 0x165   : > { %p864_p8 = pnand %p863_p6, %p857_p2 }
 0x167   : > { %867 = shalt.err (!%p864_p8)
}
 0x168   : > { %s933_s24 = smov 64   ;;  %s934_s11 = smov 4  }
 0x169   : > { %699 = dma.vmem_to_hbm [thread:$0]  (%p1054_p10), %s1141_s10, 512, %s1146_s18, %s458_s25, %s933_s24, %s933_s24, %s934_s11  }
 0x16a PF: > { %s488_s15 = sand.u32 1, %s906_s12   ;;  %p1216_p12 = scmp.ne.s32.totalorder %s1206_s23, 0 }
 0x16b   : > { %p1217_p11 = scmp.ge.s32.totalorder %s926_s17, 2  ;;  %s489_s9 = scalar_lea.sflag [#allocation4], %s488_s15 }
 0x16d   : > { %p710_p0 = pnand %p1217_p11, %p1216_p12 }
 0x16f   : > { %901 = dma.done.wait (!%p710_p0), %s489_s9, 512  }
 0x170   : > { %903 = vsyncadd (!%p710_p0), %s489_s9, 4294966784  ;;  %s20_s17 = sadd.s32 1, %s926_s17   ;;  %s1218_s12 = smov %s910_s13 }
 0x171   : > { %p17_p5 = scmp.ge.s32.totalorder %s20_s17, 4   ;;  %s1219_s13 = smov %s914_s14 }
 0x172   : > { %s1220_s14 = smov %s1063_s5  ;;  %s1221_s15 = smov %s922_s16 }
 0x173   : > { %s1222_s16 = smov %s1224_s28  ;;  %19 = sbr.rel (!%p17_p5) target bundleno = 7 (0x7), region = 81 }
 0x17a   :  { %494 = vsyncpa [#allocation3], 1 }
 0x17b   :  { %496 = vsyncpa [#allocation3 + $0x1], 1 }
 0x17c   :  { %497 = vsyncpa [#allocation6], 1 }
 0x17d   :  { %498 = vsyncpa [#allocation4], 1 }
 0x17e   :  { %500 = vsyncpa [#allocation4 + $0x1], 1 }

</bundles_post_ra>
